<compile_context>
chip_gen: v5e
topology: v5e:2x2
jax: 0.10.0
libtpu: 0.0.40
codegen_flags: <defaults>
</compile_context>

<pallas_src>
import functools

import jax
import jax.numpy as jnp
from jax import lax
from jax.experimental import pallas as pl
from jax.experimental.pallas import tpu as pltpu

_LANES = 128
_TARGET_BLOCK_BYTES = 2 * 1024 * 1024  # ~2 MiB per input block per buffer


def _round_up(x, m):
    return ((x + m - 1) // m) * m


def _deviation_loss_kernel(pred_ref, mean_ref, out_ref, acc_ref, *,
                           activation, n, block_rows, blocks_per_core,
                           mean_is_scalar):
    c = pl.program_id(0)          # TensorCore split ("parallel")
    i = pl.program_id(1)          # reduction over row blocks ("arbitrary")

    @pl.when(i == 0)
    def _():
        acc_ref[...] = jnp.zeros_like(acc_ref)

    # Tail mask from the *logical* (unclamped) block index; grid steps whose
    # block index was clamped by the index_map land fully outside [0, n) and
    # therefore contribute zero.
    start_elem = (c * blocks_per_core + i) * (block_rows * _LANES)
    remaining = n - start_elem
    row_ids = lax.broadcasted_iota(jnp.int32, (block_rows, _LANES), 0)
    col_ids = lax.broadcasted_iota(jnp.int32, (block_rows, _LANES), 1)
    mask = (row_ids * _LANES + col_ids) < remaining

    p = pred_ref[...].astype(jnp.float32)
    if mean_is_scalar:
        m = mean_ref[0]                         # f32 scalar resident in SMEM
    else:
        m = mean_ref[...].astype(jnp.float32)
    diff = p - m
    if activation == "relu":
        loss = jnp.maximum(diff, 0.0)
    elif activation == "abs":
        loss = jnp.abs(diff)
    else:  # "none"
        loss = diff
    loss = jnp.where(mask, loss, 0.0)           # mask gates the loss itself

    # Fold (block_rows,128) -> (8,128): pure VALU vreg adds, no XLU, no
    # per-step full-tile store into a big accumulator.
    acc_ref[...] += loss.reshape(block_rows // 8, 8, _LANES).sum(axis=0)

    @pl.when(i == pl.num_programs(1) - 1)
    def _():
        out_ref[...] = acc_ref[...]             # lane-dense partial-sum tile


def deviation_loss(pred, condition_pred_mean, *, activation="abs",
                   reduction="mean", max_block_rows=None):
    assert activation in ("relu", "abs", "none"), "Invalid activation function"
    assert reduction in ("mean", "sum"), "Invalid reduction method"

    pred = jnp.asarray(pred)
    mean = jnp.asarray(condition_pred_mean)

    out_dtype = jnp.result_type(pred.dtype, mean.dtype)
    if not jnp.issubdtype(out_dtype, jnp.floating):
        out_dtype = jnp.float32

    shape = jnp.broadcast_shapes(pred.shape, mean.shape)
    n = 1
    for d in shape:
        n *= int(d)
    assert n > 0, "DeviationLoss on an empty tensor"

    mean_is_scalar = (mean.size == 1)

    if pred.shape != shape:
        pred = jnp.broadcast_to(pred, shape)
    if (not mean_is_scalar) and mean.shape != shape:
        # TODO(synk): stream low-rank (per-row/per-column) means without
        # materializing the broadcast in HBM; only the scalar case is
        # de-broadcast today.
        mean = jnp.broadcast_to(mean, shape)

    # Lane-dense streaming view (rows, 128) in the *native* HBM dtype.
    rows = pl.cdiv(n, _LANES)
    padded = rows * _LANES
    p = pred.reshape(-1)
    if padded != n:
        # Minimal (<128 elem) pad just to make the reshape legal; the values
        # never contribute because of the in-kernel tail mask.
        p = jnp.pad(p, (0, padded - n))
    p2 = p.reshape(rows, _LANES)

    itemsizes = [p2.dtype.itemsize]
    if mean_is_scalar:
        mean_arg = mean.reshape(1).astype(jnp.float32)
    else:
        m = mean.reshape(-1)
        if padded != n:
            m = jnp.pad(m, (0, padded - n))
        m2 = m.reshape(rows, _LANES)
        itemsizes.append(m2.dtype.itemsize)

    # Sublane packing requirement: f32 -> 8 rows, bf16 -> 16, 8-bit -> 32.
    sublane_mult = max(8 * max(1, 4 // it) for it in itemsizes)

    if max_block_rows is None:
        max_block_rows = _TARGET_BLOCK_BYTES // (_LANES * max(itemsizes))
    block_rows = min(int(max_block_rows), _round_up(rows, sublane_mult))
    block_rows = max(sublane_mult, (block_rows // sublane_mult) * sublane_mult)

    total_blocks = pl.cdiv(rows, block_rows)
    num_cores = 2 if total_blocks >= 2 else 1   # v7x: 2 TCs; no-op on v5e/v6e
    blocks_per_core = pl.cdiv(total_blocks, num_cores)

    def stream_index_map(c, i):
        # The grid may overhang by < blocks_per_core blocks; clamp the block
        # index (those steps are fully masked inside the kernel).
        return (jnp.minimum(c * blocks_per_core + i, total_blocks - 1), 0)

    in_specs = [pl.BlockSpec((block_rows, _LANES), stream_index_map)]
    if mean_is_scalar:
        in_specs.append(pl.BlockSpec(memory_space=pltpu.MemorySpace.SMEM))
        args = (p2, mean_arg)
    else:
        in_specs.append(pl.BlockSpec((block_rows, _LANES), stream_index_map))
        args = (p2, m2)

    kernel = functools.partial(
        _deviation_loss_kernel,
        activation=activation, n=n, block_rows=block_rows,
        blocks_per_core=blocks_per_core, mean_is_scalar=mean_is_scalar)

    partial_sums = pl.pallas_call(
        kernel,
        out_shape=jax.ShapeDtypeStruct((num_cores * 8, _LANES), jnp.float32),
        grid=(num_cores, blocks_per_core),
        in_specs=in_specs,
        out_specs=pl.BlockSpec((8, _LANES), lambda c, i: (c, 0)),
        scratch_shapes=[pltpu.VMEM((8, _LANES), jnp.float32)],
        compiler_params=pltpu.CompilerParams(
            dimension_semantics=("parallel", "arbitrary"),
            vmem_limit_bytes=32 * 1024 * 1024,  # footprint ~8 MiB; v7x-safe
        ),
    )(*args)

    # Tiny (<= 2048 element) reduce of the per-core partial-sum tiles.
    total = jnp.sum(partial_sums)
    if reduction == "mean":
        total = total / n
    return total.astype(out_dtype)


def _reference(pred, condition_pred_mean, activation, reduction):
    diff = (jnp.asarray(pred, jnp.float32)
            - jnp.asarray(condition_pred_mean, jnp.float32))
    if activation == "relu":
        loss = jnp.maximum(diff, 0.0)
    elif activation == "abs":
        loss = jnp.abs(diff)
    else:
        loss = diff
    return jnp.mean(loss) if reduction == "mean" else jnp.sum(loss)


if __name__ == "__main__":
    key = jax.random.PRNGKey(0)
    k1, k2, k3 = jax.random.split(key, 3)

    # Small shapes consistent with the module (per-sample prediction scores).
    B, T = 256, 16
    pred = jax.random.normal(k1, (B, T), dtype=jnp.float32)
    mean_full = jax.random.normal(k2, (B, T), dtype=jnp.float32)
    mean_scalar = jax.random.normal(k3, (), dtype=jnp.float32)

    ok = True

    def check(tag, out, ref, rtol=1e-3, atol=1e-3):
        global ok
        out = jax.block_until_ready(out)
        o = jnp.asarray(out, jnp.float32)
        r = jnp.asarray(ref, jnp.float32)
        if not jnp.allclose(o, r, rtol=rtol, atol=atol):
            ok = False
            print(f"MISMATCH {tag}: {o} vs {r}")

    for activation in ("relu", "abs", "none"):
        for reduction in ("mean", "sum"):
            ref_full = _reference(pred, mean_full, activation, reduction)
            ref_scal = _reference(pred, mean_scalar, activation, reduction)
            # Full-size mean (streamed); default single-block grid and a
            # forced multi-block / two-core grid.
            for mbr in (None, 8):
                out = deviation_loss(pred, mean_full, activation=activation,
                                     reduction=reduction, max_block_rows=mbr)
                check(f"full act={activation} red={reduction} mbr={mbr}",
                      out, ref_full)
            # Scalar mean: kept in SMEM, never broadcast/materialized in HBM.
            out = deviation_loss(pred, mean_scalar, activation=activation,
                                 reduction=reduction)
            check(f"scalar act={activation} red={reduction}", out, ref_scal)

    # Ragged size (n not a multiple of 128): exercises the in-kernel tail mask.
    pred_r = pred[:100, :7]
    out = deviation_loss(pred_r, mean_scalar, activation="abs", reduction="mean")
    check("ragged", out, _reference(pred_r, mean_scalar, "abs", "mean"))

    # Native bf16 streaming (half the HBM bytes; block rows auto-align to 16).
    pred_bf = pred.astype(jnp.bfloat16)
    mean_bf = mean_scalar.astype(jnp.bfloat16)
    out = deviation_loss(pred_bf, mean_bf, activation="abs", reduction="mean")
    check("bf16", out, _reference(pred_bf, mean_bf, "abs", "mean"),
          rtol=2e-2, atol=2e-2)

    if ok:
        print("KERNEL_OK")
</pallas_src>

<mosaic_0001>
module attributes {stable_mosaic.version = 11 : i64} {
  func.func @_deviation_loss_kernel(%arg0: i32, %arg1: i32, %arg2: memref<32x128xf32, #tpu.memory_space<vmem>>, %arg3: memref<32x128xf32, #tpu.memory_space<vmem>>, %arg4: memref<8x128xf32, #tpu.memory_space<vmem>>, %arg5: memref<8x128xf32, #tpu.memory_space<vmem>>) attributes {dimension_semantics = [#tpu.dimension_semantics<parallel>, #tpu.dimension_semantics<arbitrary>], iteration_bounds = array<i64: 1, 1>, scalar_prefetch = 0 : i64, scratch_operands = 1 : i64, tpu.core_type = #tpu.core_type<tc>, window_params = [{transform_indices = @transform_0, window_bounds = array<i64: 32, 128>}, {transform_indices = @transform_1, window_bounds = array<i64: 32, 128>}, {transform_indices = @transform_2, window_bounds = array<i64: 8, 128>}]} {
    %c0_i32 = arith.constant 0 : i32
    %0 = arith.cmpi eq, %arg1, %c0_i32 : i32
    %1 = arith.extui %0 : i1 to i32
    %c0_i32_0 = arith.constant 0 : i32
    %2 = arith.cmpi ne, %1, %c0_i32_0 : i32
    scf.if %2 {
      %cst_13 = arith.constant 0.000000e+00 : f32
      %29 = vector.broadcast %cst_13 : f32 to vector<8x128xf32>
      %c0_14 = arith.constant 0 : index
      %c0_15 = arith.constant 0 : index
      %30 = vector.load %arg5[%c0_14, %c0_15] : memref<8x128xf32, #tpu.memory_space<vmem>>, vector<8x128xf32>
      tpu.vector_store %arg5[%c0_14, %c0_15], %29 {strides = array<i32>} : memref<8x128xf32, #tpu.memory_space<vmem>>, vector<8x128xf32>,
    } else {
    }
    %c1_i32 = arith.constant 1 : i32
    %3 = arith.muli %arg0, %c1_i32 : i32
    %4 = arith.addi %3, %arg1 : i32
    %c4096_i32 = arith.constant 4096 : i32
    %5 = arith.muli %4, %c4096_i32 : i32
    %c4096_i32_1 = arith.constant 4096 : i32
    %6 = arith.subi %c4096_i32_1, %5 : i32
    %7 = tpu.iota {dimensions = array<i32: 0>} : vector<32x128xi32>
    %8 = tpu.iota {dimensions = array<i32: 1>} : vector<32x128xi32>
    %c128_i32 = arith.constant 128 : i32
    %9 = vector.broadcast %c128_i32 : i32 to vector<32x128xi32>
    %10 = arith.muli %7, %9 : vector<32x128xi32>
    %11 = arith.addi %10, %8 : vector<32x128xi32>
    %12 = vector.broadcast %6 : i32 to vector<32x128xi32>
    %13 = arith.cmpi slt, %11, %12 : vector<32x128xi32>
    %c0 = arith.constant 0 : index
    %c0_2 = arith.constant 0 : index
    %14 = vector.load %arg2[%c0, %c0_2] : memref<32x128xf32, #tpu.memory_space<vmem>>, vector<32x128xf32>
    %c0_3 = arith.constant 0 : index
    %c0_4 = arith.constant 0 : index
    %15 = vector.load %arg3[%c0_3, %c0_4] : memref<32x128xf32, #tpu.memory_space<vmem>>, vector<32x128xf32>
    %16 = arith.subf %14, %15 : vector<32x128xf32>
    %cst = arith.constant 0.000000e+00 : f32
    %17 = vector.broadcast %cst : f32 to vector<32x128xf32>
    %18 = arith.maximumf %16, %17 : vector<32x128xf32>
    %cst_5 = arith.constant 0.000000e+00 : f32
    %19 = vector.broadcast %cst_5 : f32 to vector<32x128xf32>
    %20 = arith.select %13, %18, %19 : vector<32x128xi1>, vector<32x128xf32>
    %c0_6 = arith.constant 0 : index
    %c0_7 = arith.constant 0 : index
    %21 = vector.load %arg5[%c0_6, %c0_7] : memref<8x128xf32, #tpu.memory_space<vmem>>, vector<8x128xf32>
    %22 = vector.shape_cast %20 : vector<32x128xf32> to vector<4x8x128xf32>
    %cst_8 = arith.constant dense<0.000000e+00> : vector<8x128xf32>
    %23 = vector.multi_reduction <add>, %22, %cst_8 [0] : vector<4x8x128xf32> to vector<8x128xf32>
    %24 = arith.addf %21, %23 : vector<8x128xf32>
    %c0_9 = arith.constant 0 : index
    %c0_10 = arith.constant 0 : index
    %25 = vector.load %arg5[%c0_9, %c0_10] : memref<8x128xf32, #tpu.memory_space<vmem>>, vector<8x128xf32>
    tpu.vector_store %arg5[%c0_9, %c0_10], %24 {strides = array<i32>} : memref<8x128xf32, #tpu.memory_space<vmem>>, vector<8x128xf32>,
    %c0_i32_11 = arith.constant 0 : i32
    %26 = arith.cmpi eq, %arg1, %c0_i32_11 : i32
    %27 = arith.extui %26 : i1 to i32
    %c0_i32_12 = arith.constant 0 : i32
    %28 = arith.cmpi ne, %27, %c0_i32_12 : i32
    scf.if %28 {
      %c0_13 = arith.constant 0 : index
      %c0_14 = arith.constant 0 : index
      %29 = vector.load %arg5[%c0_13, %c0_14] : memref<8x128xf32, #tpu.memory_space<vmem>>, vector<8x128xf32>
      %c0_15 = arith.constant 0 : index
      %c0_16 = arith.constant 0 : index
      %30 = vector.load %arg4[%c0_15, %c0_16] : memref<8x128xf32, #tpu.memory_space<vmem>>, vector<8x128xf32>
      tpu.vector_store %arg4[%c0_15, %c0_16], %29 {strides = array<i32>} : memref<8x128xf32, #tpu.memory_space<vmem>>, vector<8x128xf32>,
    } else {
    }
    return
  }
  func.func @transform_0(%arg0: i32, %arg1: i32) -> (i32, i32) {
    %c1_i32 = arith.constant 1 : i32
    %0 = arith.muli %arg0, %c1_i32 : i32
    %1 = arith.addi %0, %arg1 : i32
    %c0_i32 = arith.constant 0 : i32
    %2 = arith.minsi %1, %c0_i32 : i32
    %c0_i32_0 = arith.constant 0 : i32
    %c0_i32_1 = arith.constant 0 : i32
    return %2, %c0_i32_0 : i32, i32
  }
  func.func @transform_1(%arg0: i32, %arg1: i32) -> (i32, i32) {
    %c1_i32 = arith.constant 1 : i32
    %0 = arith.muli %arg0, %c1_i32 : i32
    %1 = arith.addi %0, %arg1 : i32
    %c0_i32 = arith.constant 0 : i32
    %2 = arith.minsi %1, %c0_i32 : i32
    %c0_i32_0 = arith.constant 0 : i32
    %c0_i32_1 = arith.constant 0 : i32
    return %2, %c0_i32_0 : i32, i32
  }
  func.func @transform_2(%arg0: i32, %arg1: i32) -> (i32, i32) {
    %c0_i32 = arith.constant 0 : i32
    %c0_i32_0 = arith.constant 0 : i32
    return %arg0, %c0_i32 : i32, i32
  }
}

</mosaic_0001>

<bundles_post_ra>
// kernel: tpu_custom_call.1
= control target key start
LH: loop header
LB: loop body
LE: loop exit
PB: predicated region body
PF: predicated region fallthrough
CT: control target
= control target key end

     0   :  { %7 = vsyncpa [#allocation4], 0  ;;  %s257_s0 = inlined_call_operand.hbm [shape: f32[32,128], index: 0, kind: input, shape index: {}]   ;;  %s258_s1 = inlined_call_operand.hbm [shape: f32[32,128], index: 1, kind: input, shape index: {}]   ;;  %s259_s2 = inlined_call_operand.hbm [shape: f32[8,128], index: 2, kind: output, shape index: {}]  }
   0x1   :  { %8 = vsyncpa [#allocation7], 0 }
   0x2   :  { %9 = vsyncpa [#allocation5], 0  ;;  %s20_s11 = sshll.u32 %s257_s0, 4  ;;  %s228_s12 = smov [#allocation3]   ;;  %s21_s11 = int_to_ptr.hbm [resolvable:$true] %s20_s11 }
   0x3   :  { %s22_s13 = sshll.u32 %s228_s12, 4  ;;  %s39_s16 = sshll.u32 %s258_s1, 4  ;;  %s23_s13 = int_to_ptr.vmem [resolvable:$true] %s22_s13  ;;  %s40_s16 = int_to_ptr.hbm [resolvable:$true] %s39_s16 }
   0x4   :  { %s229_s17 = smov 128   ;;  %s230_s18 = smov 8  }
   0x5   :  { %28 = dma.hbm_to_vmem [thread:$0]  %s21_s11, 512, %s23_s13, [#allocation4], %s229_s17, %s229_s17, %s230_s18  }
   0x6   :  { %s231_s19 = smov [#allocation6]  }
   0x7   :  { %s41_s20 = sshll.u32 %s231_s19, 4  ;;  %s42_s20 = int_to_ptr.vmem [resolvable:$true] %s41_s20 }
   0x8   :  { %47 = dma.hbm_to_vmem [thread:$0]  %s40_s16, 512, %s42_s20, [#allocation7], %s229_s17, %s229_s17, %s230_s18  }
   0x9   :  { %222 = dma.done.wait [#allocation4], 512  }
   0xa   :  { %223 = vsyncadd [#allocation4], 4294966784 }
   0xb   :  { %224 = dma.done.wait [#allocation7], 512  }
   0xc   :  { %225 = vsyncadd [#allocation7], 4294966784  ;;  %v72_v0 = vlaneseq  ;;  %v92_v11 = vld [vmem:[#allocation3] sm:$0xff]  ;;  %v93_v12 = vld [vmem:[#allocation3 + $0x8] sm:$0xff]  ;;  %s232_s0 = smov [#allocation8]   ;;  %s130_s23 = sshll.u32 %s259_s2, 4  ;;  %s131_s23 = int_to_ptr.hbm [resolvable:$true] %s130_s23 }
   0xd   :  { %v94_v13 = vld [vmem:[#allocation3 + $0x10] sm:$0xff]  ;;  %v95_v17 = vld [vmem:[#allocation3 + $0x18] sm:$0xff]  ;;  %v96_v18 = vld [vmem:[#allocation6] sm:$0xff]  ;;  %s128_s1 = sshll.u32 %s232_s0, 4  ;;  %s129_s1 = int_to_ptr.vmem [resolvable:$true] %s128_s1 }
   0xe   :  { %v73_v1 = vshrl.u32 %v72_v0, 7  ;;  %v78_v2 = vand.u32 127, %v72_v0  ;;  %v97_v19 = vld [vmem:[#allocation6 + $0x8] sm:$0xff]  ;;  %v98_v20 = vld [vmem:[#allocation6 + $0x10] sm:$0xff]  ;;  %v99_v21 = vld [vmem:[#allocation6 + $0x18] sm:$0xff]  ;;  %v100_v22 = vsub.f32 %v92_v11, %v96_v18 }
   0xf   :  { %v101_v23 = vsub.f32 %v93_v12, %v97_v19  ;;  %v102_v24 = vsub.f32 %v94_v13, %v98_v20  ;;  %v103_v25 = vsub.f32 %v95_v17, %v99_v21 }
  0x10   :  { %v74_v3 = vadd.s32 8, %v73_v1  ;;  %v75_v4 = vadd.s32 16, %v73_v1  ;;  %v76_v5 = vadd.s32 24, %v73_v1  ;;  %v79_v6 = vmul.u32 128, %v73_v1 }
  0x11   :  { %v104_v26 = vmax.f32 %v100_v22, 0.0  ;;  %v105_v27 = vmax.f32 %v101_v23, 0.0  ;;  %v106_v28 = vmax.f32 %v102_v24, 0.0  ;;  %v107_v29 = vmax.f32 %v103_v25, 0.0 }
  0x12   :  { %v80_v7 = vmul.u32 128, %v74_v3  ;;  %v81_v8 = vmul.u32 128, %v75_v4  ;;  %v82_v9 = vmul.u32 128, %v76_v5  ;;  %v83_v10 = vadd.s32 %v79_v6, %v78_v2 }
  0x14   :  { %v84_v14 = vadd.s32 %v80_v7, %v78_v2  ;;  %v85_v15 = vadd.s32 %v81_v8, %v78_v2  ;;  %v86_v16 = vadd.s32 %v82_v9, %v78_v2  ;;  %vm88_vm0 = vcmp.lt.s32.totalorder %v83_v10, 4096 }
  0x15   :  { %v108_v30 = vsel %vm88_vm0, %v104_v26, 0.0 }
  0x16   :  { %vm89_vm1 = vcmp.lt.s32.totalorder %v84_v14, 4096  ;;  %vm90_vm2 = vcmp.lt.s32.totalorder %v85_v15, 4096  ;;  %vm91_vm3 = vcmp.lt.s32.totalorder %v86_v16, 4096 }
  0x17   :  { %v109_v31 = vsel %vm89_vm1, %v105_v27, 0.0  ;;  %v110_v32 = vsel %vm90_vm2, %v106_v28, 0.0  ;;  %v111_v34 = vsel %vm91_vm3, %v107_v29, 0.0 }
  0x18   :  { %v113_v33 = vadd.f32 %v109_v31, %v108_v30 }
  0x1a   :  { %v114_v35 = vadd.f32 %v113_v33, %v110_v32 }
  0x1c   :  { %v115_v36 = vadd.f32 %v114_v35, %v111_v34 }
  0x1e   :  { %122 = vst [vmem:[#allocation8] sm:$0xff] %v115_v36 }
  0x1f   :  { %133 = dma.vmem_to_hbm [thread:$0]  %s129_s1, 128, %s131_s23, [#allocation5]  }
  0x20   :  { %226 = dma.done.wait [#allocation5], 128  }
  0x21   :  { %227 = vsyncadd [#allocation5], 4294967168 }
  0x22   :  { %138 = vsyncpa [#allocation4], 1 }
  0x23   :  { %139 = vsyncpa [#allocation7], 1 }
  0x24   :  { %140 = vsyncpa [#allocation5], 1 }

</bundles_post_ra>
